<compile_context>
chip_gen: v7x
topology: tpu7x:2x2x1
jax: 0.10.0
libtpu: 0.0.40
codegen_flags: <defaults>
</compile_context>

<pallas_src>
import jax
import jax.numpy as jnp
from jax.experimental import pallas as pl
from jax.experimental.pallas import tpu as pltpu


def _learned_noise_kernel(noise_ref, w_ref, o_ref):
    # noise_ref: VMEM (TB, HW)    float32  -- per-sample noise, shared over C
    # w_ref:     VMEM (C, 1)      float32  -- per-channel scale
    # o_ref:     VMEM (TB, C, HW) float32  -- lane-dense output block
    noise = noise_ref[...]                       # (TB, HW)
    w = w_ref[...]                               # (C, 1)
    out = noise[:, None, :] * w[None, :, :]      # (TB, C, HW) VPU broadcast
    o_ref[...] = out.astype(o_ref.dtype)


def _pick_batch_tile(batch, c, hw, max_bytes=8 << 20):
    # Largest divisor of `batch` whose output block stays under ~8 MiB
    # (safe for v7x's 32 MiB scoped / 64 MiB physical VMEM with double
    # buffering; plenty of headroom on v5e/v6e too).
    best = 1
    for tb in range(1, batch + 1):
        if batch % tb == 0 and tb * c * hw * 4 <= max_bytes:
            best = tb
    return best


def learned_noise_forward(x, weight, key):
    """x: (B, C, H, W) NCHW (used only for shape); weight: (1, C, 1, 1)."""
    B, C, H, W = x.shape
    HW = H * W

    # Fresh N(0,1) noise per forward call, shared across channels
    # (matches the (B, 1, H, W) noise tensor of the reference module).
    noise = jax.random.normal(key, (B, HW), dtype=jnp.float32)
    w = weight.reshape(C, 1).astype(jnp.float32)

    TB = _pick_batch_tile(B, C, HW)
    grid = (B // TB,)

    out_flat = pl.pallas_call(
        _learned_noise_kernel,
        out_shape=jax.ShapeDtypeStruct((B, C, HW), jnp.float32),
        grid=grid,
        in_specs=[
            pl.BlockSpec((TB, HW), lambda b: (b, 0)),
            pl.BlockSpec((C, 1), lambda b: (0, 0)),
        ],
        out_specs=pl.BlockSpec((TB, C, HW), lambda b: (b, 0, 0)),
        compiler_params=pltpu.CompilerParams(
            dimension_semantics=("parallel",),
        ),
    )(noise, w)

    # Free contiguous-view reshape back to NCHW.
    return out_flat.reshape(B, C, H, W)


if __name__ == "__main__":
    B, C, H, W = 2, 4, 16, 16
    key = jax.random.PRNGKey(0)
    k_w, k_x, k_noise = jax.random.split(key, 3)

    # Deterministic parameter init, matching nn.Parameter(torch.randn(1,C,1,1)*0.1)
    weight = jax.random.normal(k_w, (1, C, 1, 1), dtype=jnp.float32) * 0.1
    # Input (ignored by the forward pass, like the PyTorch module).
    x = jax.random.normal(k_x, (B, C, H, W), dtype=jnp.float32)

    out = learned_noise_forward(x, weight, k_noise)
    out = jax.block_until_ready(out)

    assert out.shape == (B, C, H, W)
    assert out.dtype == jnp.float32
    # Sanity: noise is shared across channels, so out[b, c] / weight[c] must
    # match across channels (weight init is nonzero with prob 1).
    ratio0 = out[:, 0] / weight[0, 0, 0, 0]
    ratio1 = out[:, 1] / weight[0, 1, 0, 0]
    assert jnp.allclose(ratio0, ratio1, rtol=1e-4, atol=1e-4)
    # Sanity: kernel result matches the pure-JAX reference exactly.
    noise_ref = jax.random.normal(k_noise, (B, H * W), dtype=jnp.float32)
    expected = noise_ref.reshape(B, 1, H, W) * weight
    assert jnp.allclose(out, expected, rtol=1e-6, atol=1e-6)

    print("KERNEL_OK")
</pallas_src>

<mosaic_0001>
module attributes {stable_mosaic.version = 11 : i64} {
  func.func @_learned_noise_kernel(%arg0: i32, %arg1: memref<2x256xf32, #tpu.memory_space<vmem>>, %arg2: memref<4x1xf32, #tpu.memory_space<vmem>>, %arg3: memref<2x4x256xf32, #tpu.memory_space<vmem>>) attributes {dimension_semantics = [#tpu.dimension_semantics<parallel>], iteration_bounds = array<i64: 1>, scalar_prefetch = 0 : i64, scratch_operands = 0 : i64, tpu.core_type = #tpu.core_type<tc>, window_params = [{transform_indices = @transform_0, window_bounds = array<i64: 2, 256>}, {pipeline_mode = #tpu.pipeline_mode<synchronous>, transform_indices = @transform_1, window_bounds = array<i64: 4, 1>}, {transform_indices = @transform_2, window_bounds = array<i64: 2, 4, 256>}]} {
    %c0 = arith.constant 0 : index
    %c0_0 = arith.constant 0 : index
    %0 = vector.load %arg1[%c0, %c0_0] : memref<2x256xf32, #tpu.memory_space<vmem>>, vector<2x256xf32>
    %c0_1 = arith.constant 0 : index
    %c0_2 = arith.constant 0 : index
    %1 = vector.load %arg2[%c0_1, %c0_2] : memref<4x1xf32, #tpu.memory_space<vmem>>, vector<4x1xf32>
    %2 = vector.shape_cast %0 : vector<2x256xf32> to vector<2x1x256xf32>
    %3 = vector.shape_cast %1 : vector<4x1xf32> to vector<1x4x1xf32>
    %4 = vector.broadcast %2 : vector<2x1x256xf32> to vector<2x4x256xf32>
    %5 = vector.broadcast %3 : vector<1x4x1xf32> to vector<2x4x256xf32>
    %6 = arith.mulf %4, %5 : vector<2x4x256xf32>
    %c0_3 = arith.constant 0 : index
    %c0_4 = arith.constant 0 : index
    %c0_5 = arith.constant 0 : index
    %7 = vector.load %arg3[%c0_3, %c0_4, %c0_5] : memref<2x4x256xf32, #tpu.memory_space<vmem>>, vector<2x4x256xf32>
    tpu.vector_store %arg3[%c0_3, %c0_4, %c0_5], %6 {strides = array<i32>} : memref<2x4x256xf32, #tpu.memory_space<vmem>>, vector<2x4x256xf32>,
    return
  }
  func.func @transform_0(%arg0: i32) -> (i32, i32) {
    %c0_i32 = arith.constant 0 : i32
    %c0_i32_0 = arith.constant 0 : i32
    return %arg0, %c0_i32 : i32, i32
  }
  func.func @transform_1(%arg0: i32) -> (i32, i32) {
    %c0_i32 = arith.constant 0 : i32
    %c0_i32_0 = arith.constant 0 : i32
    %c0_i32_1 = arith.constant 0 : i32
    return %c0_i32, %c0_i32_0 : i32, i32
  }
  func.func @transform_2(%arg0: i32) -> (i32, i32, i32) {
    %c0_i32 = arith.constant 0 : i32
    %c0_i32_0 = arith.constant 0 : i32
    %c0_i32_1 = arith.constant 0 : i32
    return %arg0, %c0_i32, %c0_i32_0 : i32, i32, i32
  }
}

</mosaic_0001>

<bundles_post_ra>
// kernel: tpu_custom_call.1
= control target key start
LH: loop header
LB: loop body
LE: loop exit
PB: predicated region body
PF: predicated region fallthrough
CT: control target
= control target key end

     0   :  { %s145_s0 = inlined_call_operand.vmem [shape: f32[2,256], index: 0, kind: input, shape index: {}]   ;;  %s146_s1 = inlined_call_operand.vmem [shape: f32[4,1], index: 1, kind: input, shape index: {}]   ;;  %s147_s2 = inlined_call_operand.hbm [shape: f32[2,4,256], index: 2, kind: output, shape index: {}]  }
   0x1   :  { %v13_v0 = vld [vmem:[%s146_s1] sm:$0xf] }
   0x2   :  { %7 = vsyncpa [#allocation3], 0  ;;  %v108_v1 = vmov 0   ;;  %v23_v2 = vlaneseq  ;;  %s109_s13 = smov [#allocation2]  }
   0x3   :  { %83 = vset.pattern.permute.xlu0 %v108_v1  ;;  %v78_v4 = vld.sshfl [vmem:[%s145_s0] sm:$0x33 pattern:$0x75316420]  ;;  %s67_s14 = sshll.u32 %s109_s13, 4  ;;  %s68_s14 = int_to_ptr.vmem [resolvable:$true] %s67_s14 }
   0x4   :  { %45 = vperm.xlu0 %83, %v13_v0   ;;  %v24_v3 = vshrl.u32 %v23_v2, 7  ;;  %v22_v7 = vcombine.high %v78_v4, %v78_v4  ;;  %s84_s0 = scalar_lea.vmem %s68_s14, 256  ;;  %p89_p1 = scmp.lt.s32.totalorder %s68_s14, %s68_s14 }
   0x5   :  { %p85_p0 = scmp.ne.s32.totalorder %s68_s14, %s84_s0  ;;  %p90_p2 = scmp.lt.s32.totalorder %s84_s0, %s84_s0 }
   0x6   :  { %v25_v5 = vsub.s32 0, %v24_v3  ;;  %v29_v6 = vsub.s32 1, %v24_v3 }
   0x7   :  { %p91_p3 = por %p90_p2, %p89_p1 }
   0x8   :  { %v26_v8 = vrot.slane %v78_v4, %v25_v5  ;;  %v30_v9 = vrot.slane %v78_v4, %v29_v6  ;;  %v34_v10 = vrot.slane %v22_v7, %v25_v5  ;;  %v38_v11 = vrot.slane %v22_v7, %v29_v6 }
   0x9   :  { %p92_p4 = pnand %p91_p3, %p85_p0 }
  0x83   :  { %v46_v12 = vpop.permute.xlu0 %45 }
  0x84   :  { %v48_v13 = vmul.f32 %v46_v12, %v26_v8  ;;  %v49_v14 = vmul.f32 %v46_v12, %v30_v9  ;;  %v50_v15 = vmul.f32 %v46_v12, %v34_v10  ;;  %v51_v16 = vmul.f32 %v46_v12, %v38_v11 }
  0x86   :  { %v56_v17 = vcombine.low %v48_v13, %v49_v14  ;;  %v57_v18 = vcombine.low %v50_v15, %v51_v16 }
  0x88   :  { %60 = vst [vmem:[#allocation2] sm:$0xff] %v56_v17  ;;  %61 = vst [vmem:[#allocation2 + $0x8] sm:$0xff] %v57_v18 }
  0x89   :  { %95 = shalt.err (!%p92_p4)
}
  0x8a   :  { %s96_s16 = scalar_lea.hbm %s147_s2, 256 }
  0x8b   :  { %p97_p5 = scmp.ne.s32.totalorder %s147_s2, %s96_s16  ;;  %p100_p6 = scmp.lt.u32.totalorder %s96_s16, %s147_s2 }
  0x8d   :  { %p102_p7 = pnand %p100_p6, %p97_p5 }
  0x8f   :  { %105 = shalt.err (!%p102_p7)
}
  0x90   :  { %s110_s21 = smov 128   ;;  %s111_s22 = smov 8  }
  0x91   :  { %73 = dma.vmem_to_hbm [thread:$0]  %s68_s14, 256, %s147_s2, [#allocation3], %s110_s21, %s110_s21, %s111_s22  }
  0x92   :  { %106 = dma.done.wait [#allocation3], 256  }
  0x93   :  { %107 = vsyncadd [#allocation3], 4294967040 }
  0x94   :  { %77 = vsyncpa [#allocation3], 1 }

</bundles_post_ra>
